<compile_context>
chip_gen: v5e
topology: v5e:2x2
jax: 0.10.0
libtpu: 0.0.40
codegen_flags: <defaults>
</compile_context>

<pallas_src>
import jax
import jax.numpy as jnp
import numpy as np
from jax import lax
from jax.experimental import pallas as pl
from jax.experimental.pallas import tpu as pltpu


def _mha_kernel(xq_ref, xk_ref, xv_ref,
                wq_ref, bq_ref, wk_ref, bk_ref, wv_ref, bv_ref,
                wfc_ref, bfc_ref,
                out_ref,
                q_sc, m_sc, l_sc, acc_sc, out_acc):
    # grid = (batch, q_tile, head, kv_tile)
    h = pl.program_id(2)
    kv = pl.program_id(3)
    n_h = pl.num_programs(2)
    n_kv = pl.num_programs(3)

    # Zero the cross-head output-projection accumulator once per (batch, q_tile).
    @pl.when((h == 0) & (kv == 0))
    def _():
        out_acc[...] = jnp.zeros_like(out_acc)

    # New head: project Q for this head (scale already folded into wq/bq) and reset
    # the online-softmax state.
    @pl.when(kv == 0)
    def _():
        q_f32 = jnp.dot(xq_ref[...], wq_ref[...],
                        preferred_element_type=jnp.float32) + bq_ref[...]
        q_sc[...] = q_f32.astype(jnp.bfloat16)
        m_sc[...] = jnp.full_like(m_sc, -jnp.inf)
        l_sc[...] = jnp.zeros_like(l_sc)
        acc_sc[...] = jnp.zeros_like(acc_sc)

    # Per-KV-tile K/V projection: bf16 MXU operands, f32 accumulation, f32 bias.
    k_t = (jnp.dot(xk_ref[...], wk_ref[...], preferred_element_type=jnp.float32)
           + bk_ref[...]).astype(jnp.bfloat16)                      # (Tk, D)
    v_t = (jnp.dot(xv_ref[...], wv_ref[...], preferred_element_type=jnp.float32)
           + bv_ref[...]).astype(jnp.bfloat16)                      # (Tk, D)

    # Scores: contract the last dim of both operands (no transpose / XLU relayout).
    s = lax.dot_general(q_sc[...], k_t, (((1,), (1,)), ((), ())),
                        preferred_element_type=jnp.float32)         # (Tq, Tk) f32

    # Online softmax, strictly f32.
    m_new = jnp.maximum(m_sc[...], jnp.max(s, axis=-1, keepdims=True))
    alpha = jnp.exp(m_sc[...] - m_new)
    p = jnp.exp(s - m_new)                                           # unnormalized
    l_sc[...] = alpha * l_sc[...] + jnp.sum(p, axis=-1, keepdims=True)
    acc_sc[...] = alpha * acc_sc[...] + jnp.dot(
        p.astype(jnp.bfloat16), v_t, preferred_element_type=jnp.float32)
    m_sc[...] = m_new

    # Last KV tile of this head: normalize once on the (Tq, D) accumulator and fold
    # into the per-head slice of the output projection (replaces concat + big fc dot).
    @pl.when(kv == n_kv - 1)
    def _():
        inv_l = pl.reciprocal(l_sc[...], approx=True)
        head = (acc_sc[...] * inv_l).astype(jnp.bfloat16)
        out_acc[...] += jnp.dot(head, wfc_ref[...],
                                preferred_element_type=jnp.float32)

    # Last head & last KV tile: add output bias and write back.
    @pl.when((h == n_h - 1) & (kv == n_kv - 1))
    def _():
        out_ref[...] = (out_acc[...] + bfc_ref[...]).astype(out_ref.dtype)


def _pick_tile(n, target):
    if n <= target:
        return n
    for t in (target, 512, 256, 128, 64, 32, 16, 8):
        if t <= target and n % t == 0 and t % 8 == 0:
            return t
    return n


def _vmem_limit_bytes(Tq, Tk, D):
    bf16, f32 = 2, 4
    blocks = 2 * (Tq * D * bf16 + 2 * Tk * D * bf16      # xq, xk, xv (double-buffered)
                  + 4 * D * D * bf16 + 4 * D * f32)       # per-head weights + biases
    out = 2 * Tq * D * f32
    scratch = Tq * D * bf16 + 2 * Tq * 128 * f32 + 2 * Tq * D * f32
    work = 6 * Tq * Tk * f32                              # score / prob temporaries
    total = blocks + out + scratch + work + (8 << 20)
    return int(min(max(total, 32 << 20), 64 << 20))


def multi_head_attention(input_q, input_k, input_v, params, *, n_heads, d_model,
                         q_tile=256, kv_tile=512, out_dtype=jnp.float32):
    """params: wq/wk/wv (D, H*D), wfc (H*D, D), biases (1, out_features), all f32."""
    B, S, D = input_q.shape
    H = n_heads
    assert D == d_model
    assert S % 8 == 0, "sequence length must be a multiple of 8 (sublane tiling)"

    Tq = _pick_tile(S, q_tile)
    Tk = _pick_tile(S, kv_tile)
    n_q = S // Tq
    n_kv = S // Tk

    scale = jnp.float32(1.0 / (d_model ** 0.5))

    # Per-head weight layout (H, D, D) / (H, 1, D): each grid step DMAs only one head's
    # slice, and the block's last two dims equal the full trailing dims (layout-legal
    # for any D, including D < 128).
    def per_head_w(w):                       # (D, H*D) -> (H, D, D)
        return jnp.transpose(w.reshape(D, H, D), (1, 0, 2)).astype(jnp.bfloat16)

    def per_head_b(b):                       # (1, H*D) -> (H, 1, D)
        return jnp.transpose(b.reshape(1, H, D), (1, 0, 2)).astype(jnp.float32)

    # Fold the 1/sqrt(D) softmax scale into the Q projection (trace time, zero kernel cost).
    wq = per_head_w(params["wq"] * scale)
    bq = per_head_b(params["bq"] * scale)
    wk = per_head_w(params["wk"])
    bk = per_head_b(params["bk"])
    wv = per_head_w(params["wv"])
    bv = per_head_b(params["bv"])
    wfc = params["wfc"].reshape(H, D, D).astype(jnp.bfloat16)
    bfc = params["bfc"].astype(jnp.float32)

    # Flatten (B, S, D) -> (B*S, D): all input/output blocks are plain 2-D row tiles.
    xq = input_q.reshape(B * S, D).astype(jnp.bfloat16)
    xk = input_k.reshape(B * S, D).astype(jnp.bfloat16)
    xv = input_v.reshape(B * S, D).astype(jnp.bfloat16)

    q_rows = pl.BlockSpec((Tq, D), lambda b, qi, h, k: (b * n_q + qi, 0))
    kv_rows = pl.BlockSpec((Tk, D), lambda b, qi, h, k: (b * n_kv + k, 0))
    w_head = pl.BlockSpec((None, D, D), lambda b, qi, h, k: (h, 0, 0))
    b_head = pl.BlockSpec((None, 1, D), lambda b, qi, h, k: (h, 0, 0))
    fc_bias = pl.BlockSpec((1, D), lambda b, qi, h, k: (0, 0))
    out_spec = pl.BlockSpec((Tq, D), lambda b, qi, h, k: (b * n_q + qi, 0))

    out_flat = pl.pallas_call(
        _mha_kernel,
        out_shape=jax.ShapeDtypeStruct((B * S, D), out_dtype),
        grid_spec=pltpu.PrefetchScalarGridSpec(
            num_scalar_prefetch=0,
            grid=(B, n_q, H, n_kv),
            in_specs=[
                q_rows, kv_rows, kv_rows,
                w_head, b_head, w_head, b_head, w_head, b_head,
                w_head, fc_bias,
            ],
            out_specs=out_spec,
            scratch_shapes=[
                pltpu.VMEM((Tq, D), jnp.bfloat16),   # per-head projected Q
                pltpu.VMEM((Tq, 1), jnp.float32),    # running max
                pltpu.VMEM((Tq, 1), jnp.float32),    # running denominator
                pltpu.VMEM((Tq, D), jnp.float32),    # running P@V accumulator
                pltpu.VMEM((Tq, D), jnp.float32),    # cross-head output accumulator
            ]),
        compiler_params=pltpu.CompilerParams(
            dimension_semantics=("parallel", "parallel", "arbitrary", "arbitrary"),
            vmem_limit_bytes=_vmem_limit_bytes(Tq, Tk, D)),
    )(xq, xk, xv, wq, bq, wk, bk, wv, bv, wfc, bfc)

    return out_flat.reshape(B, S, D)


def _init_params(key, d_model, n_heads):
    HD = n_heads * d_model
    ks = jax.random.split(key, 8)

    def lin(kw, kb, fan_in, fan_out):
        bound = 1.0 / np.sqrt(fan_in)
        w = jax.random.uniform(kw, (fan_in, fan_out), jnp.float32, -bound, bound)
        b = jax.random.uniform(kb, (1, fan_out), jnp.float32, -bound, bound)
        return w, b

    wq, bq = lin(ks[0], ks[1], d_model, HD)
    wk, bk = lin(ks[2], ks[3], d_model, HD)
    wv, bv = lin(ks[4], ks[5], d_model, HD)
    wfc, bfc = lin(ks[6], ks[7], HD, d_model)
    return dict(wq=wq, bq=bq, wk=wk, bk=bk, wv=wv, bv=bv, wfc=wfc, bfc=bfc)


def _reference(input_q, input_k, input_v, params, n_heads, d_model):
    """Pure-JAX f32 reference mirroring the PyTorch forward."""
    B, S, D = input_q.shape
    q = (input_q @ params["wq"] + params["bq"]).reshape(B, S, n_heads, D).transpose(0, 2, 1, 3)
    k = (input_k @ params["wk"] + params["bk"]).reshape(B, S, n_heads, D).transpose(0, 2, 1, 3)
    v = (input_v @ params["wv"] + params["bv"]).reshape(B, S, n_heads, D).transpose(0, 2, 1, 3)
    scores = jnp.einsum("bhqd,bhkd->bhqk", q, k) / (d_model ** 0.5)
    probs = jax.nn.softmax(scores, axis=-1)
    out = jnp.einsum("bhqk,bhkd->bhqd", probs, v)
    out = out.transpose(0, 2, 1, 3).reshape(B, S, n_heads * D)
    return out @ params["wfc"] + params["bfc"]


if __name__ == "__main__":
    d_model = 32
    n_heads = 4
    batch = 2
    seq = 8

    key = jax.random.PRNGKey(0)
    kq, kk, kv, kp = jax.random.split(key, 4)
    input_q = jax.random.normal(kq, (batch, seq, d_model), jnp.float32)
    input_k = jax.random.normal(kk, (batch, seq, d_model), jnp.float32)
    input_v = jax.random.normal(kv, (batch, seq, d_model), jnp.float32)
    params = _init_params(kp, d_model, n_heads)

    out = multi_head_attention(input_q, input_k, input_v, params,
                               n_heads=n_heads, d_model=d_model)
    out = jax.block_until_ready(out)

    ref = _reference(input_q, input_k, input_v, params, n_heads, d_model)
    # bf16 MXU operands + approx reciprocal -> relaxed tolerance vs the f32 reference.
    np.testing.assert_allclose(np.asarray(out), np.asarray(ref), rtol=2e-2, atol=2e-2)

    print("KERNEL_OK")
</pallas_src>

<mosaic_0001>
module attributes {stable_mosaic.version = 11 : i64} {
  func.func @_mha_kernel(%arg0: i32, %arg1: i32, %arg2: i32, %arg3: i32, %arg4: memref<8x32xbf16, #tpu.memory_space<vmem>>, %arg5: memref<8x32xbf16, #tpu.memory_space<vmem>>, %arg6: memref<8x32xbf16, #tpu.memory_space<vmem>>, %arg7: memref<1x32x32xbf16, #tpu.memory_space<vmem>>, %arg8: memref<1x1x32xf32, #tpu.memory_space<vmem>>, %arg9: memref<1x32x32xbf16, #tpu.memory_space<vmem>>, %arg10: memref<1x1x32xf32, #tpu.memory_space<vmem>>, %arg11: memref<1x32x32xbf16, #tpu.memory_space<vmem>>, %arg12: memref<1x1x32xf32, #tpu.memory_space<vmem>>, %arg13: memref<1x32x32xbf16, #tpu.memory_space<vmem>>, %arg14: memref<1x32xf32, #tpu.memory_space<vmem>>, %arg15: memref<8x32xf32, #tpu.memory_space<vmem>>, %arg16: memref<8x32xbf16, #tpu.memory_space<vmem>>, %arg17: memref<8x1xf32, #tpu.memory_space<vmem>>, %arg18: memref<8x1xf32, #tpu.memory_space<vmem>>, %arg19: memref<8x32xf32, #tpu.memory_space<vmem>>, %arg20: memref<8x32xf32, #tpu.memory_space<vmem>>) attributes {dimension_semantics = [#tpu.dimension_semantics<parallel>, #tpu.dimension_semantics<parallel>, #tpu.dimension_semantics<arbitrary>, #tpu.dimension_semantics<arbitrary>], iteration_bounds = array<i64: 2, 1, 4, 1>, scalar_prefetch = 0 : i64, scratch_operands = 5 : i64, tpu.core_type = #tpu.core_type<tc>, window_params = [{transform_indices = @transform_0, window_bounds = array<i64: 8, 32>}, {transform_indices = @transform_1, window_bounds = array<i64: 8, 32>}, {transform_indices = @transform_2, window_bounds = array<i64: 8, 32>}, {transform_indices = @transform_3, window_bounds = array<i64: 1, 32, 32>}, {transform_indices = @transform_4, window_bounds = array<i64: 1, 1, 32>}, {transform_indices = @transform_5, window_bounds = array<i64: 1, 32, 32>}, {transform_indices = @transform_6, window_bounds = array<i64: 1, 1, 32>}, {transform_indices = @transform_7, window_bounds = array<i64: 1, 32, 32>}, {transform_indices = @transform_8, window_bounds = array<i64: 1, 1, 32>}, {transform_indices = @transform_9, window_bounds = array<i64: 1, 32, 32>}, {pipeline_mode = #tpu.pipeline_mode<synchronous>, transform_indices = @transform_10, window_bounds = array<i64: 1, 32>}, {transform_indices = @transform_11, window_bounds = array<i64: 8, 32>}]} {
    %c0_i32 = arith.constant 0 : i32
    %0 = arith.cmpi eq, %arg2, %c0_i32 : i32
    %c0_i32_0 = arith.constant 0 : i32
    %1 = arith.cmpi eq, %arg3, %c0_i32_0 : i32
    %2 = arith.andi %0, %1 : i1
    %3 = arith.extui %2 : i1 to i32
    %c0_i32_1 = arith.constant 0 : i32
    %4 = arith.cmpi ne, %3, %c0_i32_1 : i32
    scf.if %4 {
      %cst_44 = arith.constant 0.000000e+00 : f32
      %60 = vector.broadcast %cst_44 : f32 to vector<8x32xf32>
      %c0_45 = arith.constant 0 : index
      %c0_46 = arith.constant 0 : index
      %61 = vector.load %arg20[%c0_45, %c0_46] : memref<8x32xf32, #tpu.memory_space<vmem>>, vector<8x32xf32>
      tpu.vector_store %arg20[%c0_45, %c0_46], %60 {strides = array<i32>} : memref<8x32xf32, #tpu.memory_space<vmem>>, vector<8x32xf32>,
    } else {
    }
    %c0_i32_2 = arith.constant 0 : i32
    %5 = arith.cmpi eq, %arg3, %c0_i32_2 : i32
    %6 = arith.extui %5 : i1 to i32
    %c0_i32_3 = arith.constant 0 : i32
    %7 = arith.cmpi ne, %6, %c0_i32_3 : i32
    scf.if %7 {
      %c0_44 = arith.constant 0 : index
      %c0_45 = arith.constant 0 : index
      %60 = vector.load %arg4[%c0_44, %c0_45] : memref<8x32xbf16, #tpu.memory_space<vmem>>, vector<8x32xbf16>
      %c0_46 = arith.constant 0 : index
      %c0_47 = arith.constant 0 : index
      %c0_48 = arith.constant 0 : index
      %61 = vector.load %arg7[%c0_46, %c0_47, %c0_48] : memref<1x32x32xbf16, #tpu.memory_space<vmem>>, vector<1x32x32xbf16>
      %62 = vector.shape_cast %61 : vector<1x32x32xbf16> to vector<32x32xbf16>
      %cst_49 = arith.constant dense<0.000000e+00> : vector<8x32xf32>
      %63 = tpu.matmul %60, %62, %cst_49 {dimension_numbers = #tpu.dot_dimension_numbers<[1], [0], [0], [1], [0, 0, 1, 1], [], []>} : vector<8x32xbf16>, vector<32x32xbf16>, vector<8x32xf32> -> vector<8x32xf32>
      %c0_50 = arith.constant 0 : index
      %c0_51 = arith.constant 0 : index
      %c0_52 = arith.constant 0 : index
      %64 = vector.load %arg8[%c0_50, %c0_51, %c0_52] : memref<1x1x32xf32, #tpu.memory_space<vmem>>, vector<1x1x32xf32>
      %65 = vector.shape_cast %64 : vector<1x1x32xf32> to vector<1x32xf32>
      %66 = vector.broadcast %65 : vector<1x32xf32> to vector<8x32xf32>
      %67 = arith.addf %63, %66 : vector<8x32xf32>
      %68 = arith.truncf %67 : vector<8x32xf32> to vector<8x32xbf16>
      %c0_53 = arith.constant 0 : index
      %c0_54 = arith.constant 0 : index
      %69 = vector.load %arg16[%c0_53, %c0_54] : memref<8x32xbf16, #tpu.memory_space<vmem>>, vector<8x32xbf16>
      tpu.vector_store %arg16[%c0_53, %c0_54], %68 {strides = array<i32>} : memref<8x32xbf16, #tpu.memory_space<vmem>>, vector<8x32xbf16>,
      %cst_55 = arith.constant 0xFF800000 : f32
      %70 = vector.broadcast %cst_55 : f32 to vector<8x1xf32>
      %c0_56 = arith.constant 0 : index
      %c0_57 = arith.constant 0 : index
      %71 = vector.load %arg17[%c0_56, %c0_57] : memref<8x1xf32, #tpu.memory_space<vmem>>, vector<8x1xf32>
      tpu.vector_store %arg17[%c0_56, %c0_57], %70 {strides = array<i32>} : memref<8x1xf32, #tpu.memory_space<vmem>>, vector<8x1xf32>,
      %cst_58 = arith.constant 0.000000e+00 : f32
      %72 = vector.broadcast %cst_58 : f32 to vector<8x1xf32>
      %c0_59 = arith.constant 0 : index
      %c0_60 = arith.constant 0 : index
      %73 = vector.load %arg18[%c0_59, %c0_60] : memref<8x1xf32, #tpu.memory_space<vmem>>, vector<8x1xf32>
      tpu.vector_store %arg18[%c0_59, %c0_60], %72 {strides = array<i32>} : memref<8x1xf32, #tpu.memory_space<vmem>>, vector<8x1xf32>,
      %cst_61 = arith.constant 0.000000e+00 : f32
      %74 = vector.broadcast %cst_61 : f32 to vector<8x32xf32>
      %c0_62 = arith.constant 0 : index
      %c0_63 = arith.constant 0 : index
      %75 = vector.load %arg19[%c0_62, %c0_63] : memref<8x32xf32, #tpu.memory_space<vmem>>, vector<8x32xf32>
      tpu.vector_store %arg19[%c0_62, %c0_63], %74 {strides = array<i32>} : memref<8x32xf32, #tpu.memory_space<vmem>>, vector<8x32xf32>,
    } else {
    }
    %c0 = arith.constant 0 : index
    %c0_4 = arith.constant 0 : index
    %8 = vector.load %arg5[%c0, %c0_4] : memref<8x32xbf16, #tpu.memory_space<vmem>>, vector<8x32xbf16>
    %c0_5 = arith.constant 0 : index
    %c0_6 = arith.constant 0 : index
    %c0_7 = arith.constant 0 : index
    %9 = vector.load %arg9[%c0_5, %c0_6, %c0_7] : memref<1x32x32xbf16, #tpu.memory_space<vmem>>, vector<1x32x32xbf16>
    %10 = vector.shape_cast %9 : vector<1x32x32xbf16> to vector<32x32xbf16>
    %cst = arith.constant dense<0.000000e+00> : vector<8x32xf32>
    %11 = tpu.matmul %8, %10, %cst {dimension_numbers = #tpu.dot_dimension_numbers<[1], [0], [0], [1], [0, 0, 1, 1], [], []>} : vector<8x32xbf16>, vector<32x32xbf16>, vector<8x32xf32> -> vector<8x32xf32>
    %c0_8 = arith.constant 0 : index
    %c0_9 = arith.constant 0 : index
    %c0_10 = arith.constant 0 : index
    %12 = vector.load %arg10[%c0_8, %c0_9, %c0_10] : memref<1x1x32xf32, #tpu.memory_space<vmem>>, vector<1x1x32xf32>
    %13 = vector.shape_cast %12 : vector<1x1x32xf32> to vector<1x32xf32>
    %14 = vector.broadcast %13 : vector<1x32xf32> to vector<8x32xf32>
    %15 = arith.addf %11, %14 : vector<8x32xf32>
    %16 = arith.truncf %15 : vector<8x32xf32> to vector<8x32xbf16>
    %c0_11 = arith.constant 0 : index
    %c0_12 = arith.constant 0 : index
    %17 = vector.load %arg6[%c0_11, %c0_12] : memref<8x32xbf16, #tpu.memory_space<vmem>>, vector<8x32xbf16>
    %c0_13 = arith.constant 0 : index
    %c0_14 = arith.constant 0 : index
    %c0_15 = arith.constant 0 : index
    %18 = vector.load %arg11[%c0_13, %c0_14, %c0_15] : memref<1x32x32xbf16, #tpu.memory_space<vmem>>, vector<1x32x32xbf16>
    %19 = vector.shape_cast %18 : vector<1x32x32xbf16> to vector<32x32xbf16>
    %cst_16 = arith.constant dense<0.000000e+00> : vector<8x32xf32>
    %20 = tpu.matmul %17, %19, %cst_16 {dimension_numbers = #tpu.dot_dimension_numbers<[1], [0], [0], [1], [0, 0, 1, 1], [], []>} : vector<8x32xbf16>, vector<32x32xbf16>, vector<8x32xf32> -> vector<8x32xf32>
    %c0_17 = arith.constant 0 : index
    %c0_18 = arith.constant 0 : index
    %c0_19 = arith.constant 0 : index
    %21 = vector.load %arg12[%c0_17, %c0_18, %c0_19] : memref<1x1x32xf32, #tpu.memory_space<vmem>>, vector<1x1x32xf32>
    %22 = vector.shape_cast %21 : vector<1x1x32xf32> to vector<1x32xf32>
    %23 = vector.broadcast %22 : vector<1x32xf32> to vector<8x32xf32>
    %24 = arith.addf %20, %23 : vector<8x32xf32>
    %25 = arith.truncf %24 : vector<8x32xf32> to vector<8x32xbf16>
    %c0_20 = arith.constant 0 : index
    %c0_21 = arith.constant 0 : index
    %26 = vector.load %arg16[%c0_20, %c0_21] : memref<8x32xbf16, #tpu.memory_space<vmem>>, vector<8x32xbf16>
    %cst_22 = arith.constant dense<0.000000e+00> : vector<8x8xf32>
    %27 = tpu.matmul %26, %16, %cst_22 {dimension_numbers = #tpu.dot_dimension_numbers<[1], [1], [0], [0], [0, 0, 1, 0], [], []>} : vector<8x32xbf16>, vector<8x32xbf16>, vector<8x8xf32> -> vector<8x8xf32>
    %c0_23 = arith.constant 0 : index
    %c0_24 = arith.constant 0 : index
    %28 = vector.load %arg17[%c0_23, %c0_24] : memref<8x1xf32, #tpu.memory_space<vmem>>, vector<8x1xf32>
    %cst_25 = arith.constant dense<0xFF800000> : vector<8xf32>
    %29 = vector.multi_reduction <maximumf>, %27, %cst_25 [1] : vector<8x8xf32> to vector<8xf32>
    %30 = vector.shape_cast %29 : vector<8xf32> to vector<8x1xf32>
    %31 = arith.maximumf %28, %30 : vector<8x1xf32>
    %c0_26 = arith.constant 0 : index
    %c0_27 = arith.constant 0 : index
    %32 = vector.load %arg17[%c0_26, %c0_27] : memref<8x1xf32, #tpu.memory_space<vmem>>, vector<8x1xf32>
    %33 = arith.subf %32, %31 : vector<8x1xf32>
    %34 = math.exp %33 : vector<8x1xf32>
    %35 = vector.broadcast %31 : vector<8x1xf32> to vector<8x8xf32>
    %36 = arith.subf %27, %35 : vector<8x8xf32>
    %37 = math.exp %36 : vector<8x8xf32>
    %c0_28 = arith.constant 0 : index
    %c0_29 = arith.constant 0 : index
    %38 = vector.load %arg18[%c0_28, %c0_29] : memref<8x1xf32, #tpu.memory_space<vmem>>, vector<8x1xf32>
    %39 = arith.mulf %34, %38 : vector<8x1xf32>
    %cst_30 = arith.constant dense<0.000000e+00> : vector<8xf32>
    %40 = vector.multi_reduction <add>, %37, %cst_30 [1] : vector<8x8xf32> to vector<8xf32>
    %41 = vector.shape_cast %40 : vector<8xf32> to vector<8x1xf32>
    %42 = arith.addf %39, %41 : vector<8x1xf32>
    %c0_31 = arith.constant 0 : index
    %c0_32 = arith.constant 0 : index
    %43 = vector.load %arg18[%c0_31, %c0_32] : memref<8x1xf32, #tpu.memory_space<vmem>>, vector<8x1xf32>
    tpu.vector_store %arg18[%c0_31, %c0_32], %42 {strides = array<i32>} : memref<8x1xf32, #tpu.memory_space<vmem>>, vector<8x1xf32>,
    %c0_33 = arith.constant 0 : index
    %c0_34 = arith.constant 0 : index
    %44 = vector.load %arg19[%c0_33, %c0_34] : memref<8x32xf32, #tpu.memory_space<vmem>>, vector<8x32xf32>
    %45 = vector.broadcast %34 : vector<8x1xf32> to vector<8x32xf32>
    %46 = arith.mulf %45, %44 : vector<8x32xf32>
    %47 = arith.truncf %37 : vector<8x8xf32> to vector<8x8xbf16>
    %cst_35 = arith.constant dense<0.000000e+00> : vector<8x32xf32>
    %48 = tpu.matmul %47, %25, %cst_35 {dimension_numbers = #tpu.dot_dimension_numbers<[1], [0], [0], [1], [0, 0, 1, 1], [], []>} : vector<8x8xbf16>, vector<8x32xbf16>, vector<8x32xf32> -> vector<8x32xf32>
    %49 = arith.addf %46, %48 : vector<8x32xf32>
    %c0_36 = arith.constant 0 : index
    %c0_37 = arith.constant 0 : index
    %50 = vector.load %arg19[%c0_36, %c0_37] : memref<8x32xf32, #tpu.memory_space<vmem>>, vector<8x32xf32>
    tpu.vector_store %arg19[%c0_36, %c0_37], %49 {strides = array<i32>} : memref<8x32xf32, #tpu.memory_space<vmem>>, vector<8x32xf32>,
    %c0_38 = arith.constant 0 : index
    %c0_39 = arith.constant 0 : index
    %51 = vector.load %arg17[%c0_38, %c0_39] : memref<8x1xf32, #tpu.memory_space<vmem>>, vector<8x1xf32>
    tpu.vector_store %arg17[%c0_38, %c0_39], %31 {strides = array<i32>} : memref<8x1xf32, #tpu.memory_space<vmem>>, vector<8x1xf32>,
    %c0_i32_40 = arith.constant 0 : i32
    %52 = arith.cmpi eq, %arg3, %c0_i32_40 : i32
    %53 = arith.extui %52 : i1 to i32
    %c0_i32_41 = arith.constant 0 : i32
    %54 = arith.cmpi ne, %53, %c0_i32_41 : i32
    scf.if %54 {
      %c0_44 = arith.constant 0 : index
      %c0_45 = arith.constant 0 : index
      %60 = vector.load %arg18[%c0_44, %c0_45] : memref<8x1xf32, #tpu.memory_space<vmem>>, vector<8x1xf32>
      %61 = tpu.reciprocal %60 {approx = true} : vector<8x1xf32> -> vector<8x1xf32>
      %c0_46 = arith.constant 0 : index
      %c0_47 = arith.constant 0 : index
      %62 = vector.load %arg19[%c0_46, %c0_47] : memref<8x32xf32, #tpu.memory_space<vmem>>, vector<8x32xf32>
      %63 = vector.broadcast %61 : vector<8x1xf32> to vector<8x32xf32>
      %64 = arith.mulf %62, %63 : vector<8x32xf32>
      %65 = arith.truncf %64 : vector<8x32xf32> to vector<8x32xbf16>
      %c0_48 = arith.constant 0 : index
      %c0_49 = arith.constant 0 : index
      %66 = vector.load %arg20[%c0_48, %c0_49] : memref<8x32xf32, #tpu.memory_space<vmem>>, vector<8x32xf32>
      %c0_50 = arith.constant 0 : index
      %c0_51 = arith.constant 0 : index
      %c0_52 = arith.constant 0 : index
      %67 = vector.load %arg13[%c0_50, %c0_51, %c0_52] : memref<1x32x32xbf16, #tpu.memory_space<vmem>>, vector<1x32x32xbf16>
      %68 = vector.shape_cast %67 : vector<1x32x32xbf16> to vector<32x32xbf16>
      %cst_53 = arith.constant dense<0.000000e+00> : vector<8x32xf32>
      %69 = tpu.matmul %65, %68, %cst_53 {dimension_numbers = #tpu.dot_dimension_numbers<[1], [0], [0], [1], [0, 0, 1, 1], [], []>} : vector<8x32xbf16>, vector<32x32xbf16>, vector<8x32xf32> -> vector<8x32xf32>
      %70 = arith.addf %66, %69 : vector<8x32xf32>
      %c0_54 = arith.constant 0 : index
      %c0_55 = arith.constant 0 : index
      %71 = vector.load %arg20[%c0_54, %c0_55] : memref<8x32xf32, #tpu.memory_space<vmem>>, vector<8x32xf32>
      tpu.vector_store %arg20[%c0_54, %c0_55], %70 {strides = array<i32>} : memref<8x32xf32, #tpu.memory_space<vmem>>, vector<8x32xf32>,
    } else {
    }
    %c3_i32 = arith.constant 3 : i32
    %55 = arith.cmpi eq, %arg2, %c3_i32 : i32
    %c0_i32_42 = arith.constant 0 : i32
    %56 = arith.cmpi eq, %arg3, %c0_i32_42 : i32
    %57 = arith.andi %55, %56 : i1
    %58 = arith.extui %57 : i1 to i32
    %c0_i32_43 = arith.constant 0 : i32
    %59 = arith.cmpi ne, %58, %c0_i32_43 : i32
    scf.if %59 {
      %c0_44 = arith.constant 0 : index
      %c0_45 = arith.constant 0 : index
      %60 = vector.load %arg20[%c0_44, %c0_45] : memref<8x32xf32, #tpu.memory_space<vmem>>, vector<8x32xf32>
      %c0_46 = arith.constant 0 : index
      %c0_47 = arith.constant 0 : index
      %61 = vector.load %arg14[%c0_46, %c0_47] : memref<1x32xf32, #tpu.memory_space<vmem>>, vector<1x32xf32>
      %62 = vector.broadcast %61 : vector<1x32xf32> to vector<8x32xf32>
      %63 = arith.addf %60, %62 : vector<8x32xf32>
      %c0_48 = arith.constant 0 : index
      %c0_49 = arith.constant 0 : index
      %64 = vector.load %arg15[%c0_48, %c0_49] : memref<8x32xf32, #tpu.memory_space<vmem>>, vector<8x32xf32>
      tpu.vector_store %arg15[%c0_48, %c0_49], %63 {strides = array<i32>} : memref<8x32xf32, #tpu.memory_space<vmem>>, vector<8x32xf32>,
    } else {
    }
    return
  }
  func.func @transform_0(%arg0: i32, %arg1: i32, %arg2: i32, %arg3: i32) -> (i32, i32) {
    %c1_i32 = arith.constant 1 : i32
    %0 = arith.muli %arg0, %c1_i32 : i32
    %1 = arith.addi %0, %arg1 : i32
    %c0_i32 = arith.constant 0 : i32
    %c0_i32_0 = arith.constant 0 : i32
    return %1, %c0_i32 : i32, i32
  }
  func.func @transform_1(%arg0: i32, %arg1: i32, %arg2: i32, %arg3: i32) -> (i32, i32) {
    %c1_i32 = arith.constant 1 : i32
    %0 = arith.muli %arg0, %c1_i32 : i32
    %1 = arith.addi %0, %arg3 : i32
    %c0_i32 = arith.constant 0 : i32
    %c0_i32_0 = arith.constant 0 : i32
    return %1, %c0_i32 : i32, i32
  }
  func.func @transform_2(%arg0: i32, %arg1: i32, %arg2: i32, %arg3: i32) -> (i32, i32) {
    %c1_i32 = arith.constant 1 : i32
    %0 = arith.muli %arg0, %c1_i32 : i32
    %1 = arith.addi %0, %arg3 : i32
    %c0_i32 = arith.constant 0 : i32
    %c0_i32_0 = arith.constant 0 : i32
    return %1, %c0_i32 : i32, i32
  }
  func.func @transform_3(%arg0: i32, %arg1: i32, %arg2: i32, %arg3: i32) -> (i32, i32, i32) {
    %c0_i32 = arith.constant 0 : i32
    %c0_i32_0 = arith.constant 0 : i32
    %c0_i32_1 = arith.constant 0 : i32
    return %arg2, %c0_i32, %c0_i32_0 : i32, i32, i32
  }
  func.func @transform_4(%arg0: i32, %arg1: i32, %arg2: i32, %arg3: i32) -> (i32, i32, i32) {
    %c0_i32 = arith.constant 0 : i32
    %c0_i32_0 = arith.constant 0 : i32
    %c0_i32_1 = arith.constant 0 : i32
    return %arg2, %c0_i32, %c0_i32_0 : i32, i32, i32
  }
  func.func @transform_5(%arg0: i32, %arg1: i32, %arg2: i32, %arg3: i32) -> (i32, i32, i32) {
    %c0_i32 = arith.constant 0 : i32
    %c0_i32_0 = arith.constant 0 : i32
    %c0_i32_1 = arith.constant 0 : i32
    return %arg2, %c0_i32, %c0_i32_0 : i32, i32, i32
  }
  func.func @transform_6(%arg0: i32, %arg1: i32, %arg2: i32, %arg3: i32) -> (i32, i32, i32) {
    %c0_i32 = arith.constant 0 : i32
    %c0_i32_0 = arith.constant 0 : i32
    %c0_i32_1 = arith.constant 0 : i32
    return %arg2, %c0_i32, %c0_i32_0 : i32, i32, i32
  }
  func.func @transform_7(%arg0: i32, %arg1: i32, %arg2: i32, %arg3: i32) -> (i32, i32, i32) {
    %c0_i32 = arith.constant 0 : i32
    %c0_i32_0 = arith.constant 0 : i32
    %c0_i32_1 = arith.constant 0 : i32
    return %arg2, %c0_i32, %c0_i32_0 : i32, i32, i32
  }
  func.func @transform_8(%arg0: i32, %arg1: i32, %arg2: i32, %arg3: i32) -> (i32, i32, i32) {
    %c0_i32 = arith.constant 0 : i32
    %c0_i32_0 = arith.constant 0 : i32
    %c0_i32_1 = arith.constant 0 : i32
    return %arg2, %c0_i32, %c0_i32_0 : i32, i32, i32
  }
  func.func @transform_9(%arg0: i32, %arg1: i32, %arg2: i32, %arg3: i32) -> (i32, i32, i32) {
    %c0_i32 = arith.constant 0 : i32
    %c0_i32_0 = arith.constant 0 : i32
    %c0_i32_1 = arith.constant 0 : i32
    return %arg2, %c0_i32, %c0_i32_0 : i32, i32, i32
  }
  func.func @transform_10(%arg0: i32, %arg1: i32, %arg2: i32, %arg3: i32) -> (i32, i32) {
    %c0_i32 = arith.constant 0 : i32
    %c0_i32_0 = arith.constant 0 : i32
    %c0_i32_1 = arith.constant 0 : i32
    return %c0_i32, %c0_i32_0 : i32, i32
  }
  func.func @transform_11(%arg0: i32, %arg1: i32, %arg2: i32, %arg3: i32) -> (i32, i32) {
    %c1_i32 = arith.constant 1 : i32
    %0 = arith.muli %arg0, %c1_i32 : i32
    %1 = arith.addi %0, %arg1 : i32
    %c0_i32 = arith.constant 0 : i32
    %c0_i32_0 = arith.constant 0 : i32
    return %1, %c0_i32 : i32, i32
  }
}

</mosaic_0001>

<bundles_post_ra>
// kernel: tpu_custom_call.1
= control target key start
LH: loop header
LB: loop body
LE: loop exit
PB: predicated region body
PF: predicated region fallthrough
CT: control target
= control target key end

     0   :  { %s2460_s0 = inlined_call_operand.hbm [shape: bf16[16,32], index: 0, kind: input, shape index: {}]   ;;  %s2461_s1 = inlined_call_operand.hbm [shape: bf16[16,32], index: 1, kind: input, shape index: {}]   ;;  %s2462_s2 = inlined_call_operand.hbm [shape: bf16[16,32], index: 2, kind: input, shape index: {}]   ;;  %s2463_s3 = inlined_call_operand.hbm [shape: bf16[4,32,32], index: 3, kind: input, shape index: {}]   ;;  %s2464_s4 = inlined_call_operand.hbm [shape: f32[4,1,32], index: 4, kind: input, shape index: {}]   ;;  %s2465_s5 = inlined_call_operand.hbm [shape: bf16[4,32,32], index: 5, kind: input, shape index: {}]   ;;  %s2466_s6 = inlined_call_operand.vmem [shape: f32[4,1,32], index: 6, kind: input, shape index: {}]   ;;  %s2467_s7 = inlined_call_operand.hbm [shape: bf16[4,32,32], index: 7, kind: input, shape index: {}]   ;;  %s2468_s8 = inlined_call_operand.hbm [shape: f32[4,1,32], index: 8, kind: input, shape index: {}]   ;;  %s2469_s9 = inlined_call_operand.hbm [shape: bf16[4,32,32], index: 9, kind: input, shape index: {}]   ;;  %s2470_s10 = inlined_call_operand.vmem [shape: f32[1,32], index: 10, kind: input, shape index: {}]   ;;  %s2471_s11 = inlined_call_operand.hbm [shape: f32[16,32], index: 11, kind: output, shape index: {}]  }
   0x1   :  { %2498 = sst [smem:[#allocation45_spill]] %s2461_s1 }
   0x2   :  { %2499 = sst [smem:[#allocation46_spill]] %s2463_s3 }
   0x3   :  { %2500 = sst [smem:[#allocation47_spill]] %s2465_s5 }
   0x4   :  { %2501 = sst [smem:[#allocation48_spill]] %s2466_s6 }
   0x5   :  { %2502 = sst [smem:[#allocation49_spill]] %s2470_s10 }
   0x6   :  { %2503 = sst [smem:[#allocation50_spill]] %s2471_s11 }
   0x7   :  { %16 = vsyncpa [#allocation8], 0 }
   0x8   :  { %18 = vsyncpa [#allocation8 + $0x1], 0 }
   0x9   :  { %19 = vsyncpa [#allocation11], 0 }
   0xa   :  { %21 = vsyncpa [#allocation11 + $0x1], 0 }
   0xb   :  { %22 = vsyncpa [#allocation14], 0 }
   0xc   :  { %24 = vsyncpa [#allocation14 + $0x1], 0 }
   0xd   :  { %25 = vsyncpa [#allocation17], 0 }
   0xe   :  { %27 = vsyncpa [#allocation17 + $0x1], 0 }
   0xf   :  { %28 = vsyncpa [#allocation20], 0 }
  0x10   :  { %30 = vsyncpa [#allocation20 + $0x1], 0 }
  0x11   :  { %31 = vsyncpa [#allocation9], 0 }
  0x12   :  { %33 = vsyncpa [#allocation9 + $0x1], 0  ;;  %s2040_s17 = smov 0   ;;  %s2042_s18 = smov 0  }
  0x13   :  { %s2044_s19 = smov 0   ;;  %s2046_s20 = smov 0  }
  0x14   :  { %s2048_s21 = smov 0   ;;  %s2050_s22 = smov 0  }
  0x15   :  { %s2052_s23 = smov 0   ;;  %s2054_s24 = smov 0  }
  0x16   :  { %s2056_s25 = smov 0   ;;  %s2058_s26 = smov 0  }
  0x17   :  { %s2060_s27 = smov 0  }
  0x18 LB: > { %2504 = sst [smem:[#allocation29_spill]] %s1936_s18  ;;  %s2096_s28 = sadd.s32 4294967295, %s1972_s27   ;;  %s1972_s27 = sphi %s2060_s27, %s39_s27   ;;  %s1968_s26 = sphi %s2058_s26, %s2559_s26   ;;  %s1964_s25 = sphi %s2056_s25, %s2564_s25   ;;  %s1960_s24 = sphi %s2054_s24, %s2557_s24   ;;  %s1956_s23 = sphi %s2052_s23, %s2563_s23   ;;  %s1952_s22 = sphi %s2050_s22, %s2562_s22   ;;  %s1948_s21 = sphi %s2048_s21, %s2561_s21   ;;  %s1944_s20 = sphi %s2046_s20, %s2560_s20   ;;  %s1940_s19 = sphi %s2044_s19, %s2555_s19   ;;  %s1936_s18 = sphi %s2042_s18, %s2554_s18   ;;  %s1932_s17 = sphi %s2040_s17, %s2553_s17  }
  0x19   : > { %2505 = sst [smem:[#allocation30_spill]] %s1940_s19  ;;  %s1315_s29 = sadd.s32 4294967294, %s1972_s27  }
  0x1a   : > { %2506 = sst [smem:[#allocation31_spill]] %s1944_s20  ;;  %s57_s30 = sadd.s32 1, %s1964_s25 }
  0x1b   : > { %2507 = sst [smem:[#allocation32_spill]] %s1956_s23  ;;  %s65_s12 = sadd.s32 1, %s1968_s26 }
  0x1c   : > { %2508 = sst [smem:[#allocation33_spill]] %s1960_s24  ;;  %p59_p0 = scmp.ge.s32.totalorder %s57_s30, 4 }
  0x1d   : > { %2509 = sst [smem:[#allocation34_spill]] %s1968_s26  ;;  %s74_s13 = sadd.s32 1, %s1952_s22 }
  0x1e   : > { %2510 = sst [smem:[#allocation35_spill]] %s1972_s27  ;;  %p81_p1 = scmp.ne.s32.totalorder %s1952_s22, %s1948_s21 }
  0x1f   : > { %2511 = sst [smem:[#allocation36_spill]] %s2096_s28  ;;  %p82_p2 = scmp.eq.s32.totalorder %s1972_s27, 0 }
  0x20   : > { %s2566_s30 = smov (%p59_p0, %s57_s30), 0  ;;  %s2568_s12 = smov (!%p59_p0, %s65_s12), %s1968_s26 }
  0x21   : > { %2512 = sst [smem:[#allocation37_spill]] %s2566_s30  ;;  %p2113_p3 = por %p82_p2, %p81_p1 }
  0x22   : > { %p2474_p4 = scmp.ne.s32.totalorder %s1948_s21, %s1944_s20  ;;  %p67_p5 = scmp.ge.s32.totalorder %s2568_s12, 2 }
  0x23   : > { %p88_p6 = scmp.eq.s32.totalorder %s2096_s28, 0  ;;  %s153_s15 = ssub.s32 %s1964_s25, %s2566_s30 }
  0x24   : > { %s156_s16 = sadd.s32 1, %s1940_s19  ;;  %s2570_s12 = smov (%p67_p5, %s2568_s12), 0 }
  0x25   : > { %2514 = sst [smem:[#allocation38_spill]] %s2570_s12  ;;  %p2130_p7 = por %p88_p6, %p2474_p4 }
  0x26   : > { %p154_p8 = scmp.eq.s32.totalorder %s153_s15, 0  ;;  %s71_s24 = ssub.s32 %s1968_s26, %s2570_s12 }
  0x27   : > { %s2515_s11 = scalar_select %p2130_p7, 1, 0 }
  0x28   : > { %p163_p9 = scmp.ne.s32.totalorder %s1940_s19, %s1936_s18  ;;  %p72_p10 = scmp.eq.s32.totalorder %s71_s24, 0 }
  0x29   : > { %2516 = sst [smem:[#allocation39_spill]] %s2515_s11  ;;  %p169_p11 = scmp.ne.s32.totalorder %s1936_s18, %s1932_s17 }
  0x2a   : > { %s2141_s30 = scalar_select %p154_p8, %s1940_s19, %s156_s16  }
  0x2b   : > { %s2144_s10 = scalar_select %p72_p10, %s1952_s22, %s74_s13  }
  0x2c   : > { %2517 = sst [smem:[#allocation40_spill]] %s2141_s30  ;;  %p2148_p12 = por %p163_p9, %p82_p2 }
  0x2d   : > { %2518 = sst [smem:[#allocation41_spill]] %s2144_s10  ;;  %p2154_p13 = por %p169_p11, %p88_p6 }
  0x2e   : > { %p372_p0 = scmp.eq.s32.totalorder %s2096_s28, 7  ;;  %p378_p5 = scmp.eq.s32.totalorder %s1315_s29, 7 }
  0x2f   : > { %s2520_s15 = scalar_select %p2154_p13, 1, 0 }
  0x30   : > { %p1455_p4 = scmp.lt.s32.totalorder %s1972_s27, 8  ;;  %p2163_p8 = por %p372_p0, %p81_p1 }
  0x31   : > { %2521 = sst [smem:[#allocation42_spill]] %s2520_s15  ;;  %p2524_p10 = scmp.ne.s32.totalorder %s1948_s21, %s1944_s20 }
  0x32   : > { %s2522_s17 = scalar_select %p2163_p8, 1, 0 }
  0x33   : > { %p2170_p2 = por %p378_p5, %p2524_p10  ;;  %s2481_s13 = sand.u32 1, %s1952_s22  }
  0x34   : > { %2523 = sst [smem:[#allocation43_spill]] %s2522_s17  ;;  %s2176_s16 = sshll.u32 %s1968_s26, 2 }
  0x35   : > { %s2525_s24 = scalar_select %p2170_p2, 1, 0 }
  0x36   : > { %s2180_s29 = sshll.u32 %s2481_s13, 2  ;;  %p2186_p1 = pnand %p1455_p4, %p2113_p3 }
  0x37   : > { %2526 = sst [smem:[#allocation44_spill]] %s2525_s24  ;;  %s2191_s10 = sand.u32 1, %s1972_s27  }
  0x38   : > { %s2528_s1 = sld [smem:[#allocation45_spill]]  ;;  %s425_s20 = scalar_lea.vmem [#allocation10], %s2180_s29 }
  0x39   : > { %s434_s17 = sshll.u32 %s425_s20, 4  ;;  %p2202_p3 = pnand %p1455_p4, %p2148_p12  ;;  %s435_s17 = int_to_ptr.vmem [resolvable:$true] %s434_s17 }
  0x3a   : > { %s2483_s23 = scalar_lea.sflag [#allocation11], %s2191_s10  ;;  %p1336_p6 = scmp.ge.s32.totalorder %s1972_s27, 1 }
  0x3b   : > { %p587_p9 = scmp.lt.s32.totalorder %s1972_s27, 9  ;;  %s2214_s30 = sand.u32 1, %s1940_s19  }
  0x3c   : > { %s2217_s20 = sshll.u32 %s1964_s25, 4  ;;  %s2531_s3 = sld [smem:[#allocation46_spill]] }
  0x3d   : > { %p2219_p11 = pnand %p1336_p6, %p587_p9  ;;  %s2493_s27 = scalar_lea.sflag [#allocation14], %s2191_s10 }
  0x3e   : > { %s430_s26 = scalar_lea.hbm %s2528_s1, %s2176_s16  ;;  %s2495_s15 = smov 64  }
  0x3f   : > { %s432_s13 = sshll.u32 %s430_s26, 4  ;;  %s2224_s26 = sshll.u32 %s2214_s30, 4  ;;  %s433_s13 = int_to_ptr.hbm [resolvable:$true] %s432_s13 }
  0x40   : > { %1429 = dma.hbm_to_vmem [thread:$0]  (!%p2186_p1), %s433_s13, 64, %s435_s17, %s2483_s23  }
  0x41   : > { %s465_s23 = scalar_lea.vmem [#allocation13], %s2224_s26  ;;  %s1975_s18 = smov 4  }
  0x42   : > { %s470_s17 = scalar_lea.hbm %s2531_s3, %s2217_s20  ;;  %s473_s19 = sshll.u32 %s465_s23, 4  ;;  %s474_s19 = int_to_ptr.vmem [resolvable:$true] %s473_s19 }
  0x43   : > { %s471_s13 = sshll.u32 %s470_s17, 4  ;;  %s2532_s5 = sld [smem:[#allocation47_spill]]  ;;  %s472_s13 = int_to_ptr.hbm [resolvable:$true] %s471_s13 }
  0x44   : > { %1435 = dma.hbm_to_vmem [thread:$0]  (!%p2202_p3), %s472_s13, 256, %s474_s19, %s2493_s27, %s2495_s15, %s2495_s15, %s1975_s18  }
  0x45   : > { %s504_s23 = scalar_lea.vmem [#allocation16], %s2224_s26  ;;  %s2494_s11 = scalar_lea.sflag [#allocation17], %s2191_s10 }
  0x46   : > { %s512_s3 = sshll.u32 %s504_s23, 4  ;;  %s556_s1 = scalar_lea.hbm %s2468_s8, %s1964_s25  ;;  %s513_s3 = int_to_ptr.vmem [resolvable:$true] %s512_s3 }
  0x47   : > { %s558_s24 = sshll.u32 %s556_s1, 4  ;;  %s553_s23 = scalar_lea.vmem [#allocation19], %s2214_s30  ;;  %s559_s24 = int_to_ptr.hbm [resolvable:$true] %s558_s24 }
  0x48   : > { %s2497_s27 = scalar_lea.sflag [#allocation20], %s2191_s10  ;;  %s405_s19 = scalar_lea.vmem [#allocation7], %s2180_s29 }
  0x49   : > { %s509_s17 = scalar_lea.hbm %s2532_s5, %s2217_s20  ;;  %s414_s13 = sshll.u32 %s405_s19, 4  ;;  %s415_s13 = int_to_ptr.vmem [resolvable:$true] %s414_s13 }
  0x4a   : > { %s510_s28 = sshll.u32 %s509_s17, 4  ;;  %s560_s17 = sshll.u32 %s553_s23, 4  ;;  %s511_s28 = int_to_ptr.hbm [resolvable:$true] %s510_s28  ;;  %s561_s17 = int_to_ptr.vmem [resolvable:$true] %s560_s17 }
  0x4b   : > { %1441 = dma.hbm_to_vmem [thread:$0]  (!%p2202_p3), %s511_s28, 256, %s513_s3, %s2494_s11, %s2495_s15, %s2495_s15, %s1975_s18  }
  0x4c   : > { %1447 = dma.hbm_to_vmem [thread:$0]  (!%p2202_p3), %s559_s24, 16, %s561_s17, %s2497_s27  }
  0x4d   : > { %s410_s28 = scalar_lea.hbm %s2460_s0, %s2176_s16  ;;  %s2533_s23 = sand.u32 1, %s1952_s22  }
  0x4e   : > { %s412_s1 = sshll.u32 %s410_s28, 4  ;;  %s402_s11 = scalar_lea.sflag [#allocation8], %s2533_s23  ;;  %s413_s1 = int_to_ptr.hbm [resolvable:$true] %s412_s1 }
  0x4f   : > { %1426 = dma.hbm_to_vmem [thread:$0]  (!%p2186_p1), %s413_s1, 64, %s415_s13, %s402_s11  }
  0x50   : > { %s450_s5 = scalar_lea.hbm %s2462_s2, %s2176_s16  ;;  %s445_s17 = scalar_lea.vmem [#allocation12], %s2180_s29 }
  0x51   : > { %s454_s3 = sshll.u32 %s445_s17, 4  ;;  %s452_s27 = sshll.u32 %s450_s5, 4  ;;  %s455_s3 = int_to_ptr.vmem [resolvable:$true] %s454_s3  ;;  %s453_s27 = int_to_ptr.hbm [resolvable:$true] %s452_s27 }
  0x52   : > { %s2534_s28 = scalar_lea.sflag [#allocation11], %s2191_s10  ;;  %s489_s11 = scalar_lea.hbm %s2464_s4, %s1964_s25 }
  0x53   : > { %1432 = dma.hbm_to_vmem [thread:$0]  (!%p2186_p1), %s453_s27, 64, %s455_s3, %s2534_s28  }
  0x54   : > { %s486_s13 = scalar_lea.vmem [#allocation15], %s2214_s30  ;;  %s491_s1 = sshll.u32 %s489_s11, 4  ;;  %s492_s1 = int_to_ptr.hbm [resolvable:$true] %s491_s1 }
  0x55   : > { %s493_s15 = sshll.u32 %s486_s13, 4  ;;  %s2535_s16 = scalar_lea.sflag [#allocation14], %s2191_s10  ;;  %s494_s15 = int_to_ptr.vmem [resolvable:$true] %s493_s15 }
  0x56   : > { %1438 = dma.hbm_to_vmem [thread:$0]  (!%p2202_p3), %s492_s1, 16, %s494_s15, %s2535_s16  }
  0x57   : > { %s537_s24 = scalar_lea.hbm %s2467_s7, %s2217_s20  ;;  %s532_s27 = scalar_lea.vmem [#allocation18], %s2224_s26 }
  0x58   : > { %s540_s5 = sshll.u32 %s532_s27, 4  ;;  %s538_s17 = sshll.u32 %s537_s24, 4  ;;  %s541_s5 = int_to_ptr.vmem [resolvable:$true] %s540_s5  ;;  %s539_s17 = int_to_ptr.hbm [resolvable:$true] %s538_s17 }
  0x59   : > { %s2536_s30 = smov 64   ;;  %s2537_s3 = scalar_lea.sflag [#allocation17], %s2191_s10 }
  0x5a   : > { %1444 = dma.hbm_to_vmem [thread:$0]  (!%p2202_p3), %s539_s17, 256, %s541_s5, %s2537_s3, %s2536_s30, %s2536_s30, %s1975_s18  }
  0x5b   : > { %s576_s23 = scalar_lea.hbm %s2469_s9, %s2217_s20  ;;  %s571_s11 = scalar_lea.vmem [#allocation21], %s2224_s26 }
  0x5c   : > { %s579_s13 = sshll.u32 %s571_s11, 4  ;;  %s577_s15 = sshll.u32 %s576_s23, 4  ;;  %s580_s13 = int_to_ptr.vmem [resolvable:$true] %s579_s13  ;;  %s578_s15 = int_to_ptr.hbm [resolvable:$true] %s577_s15 }
  0x5d   : > { %s2538_s1 = scalar_lea.sflag [#allocation20], %s2191_s10  ;;  %591 = sbr.rel (%p2219_p11) target bundleno = 1050 (0x41a), region = 64 }
  0x5e   : > { %1450 = dma.hbm_to_vmem [thread:$0]  (!%p2202_p3), %s578_s15, 256, %s580_s13, %s2538_s1, %s2536_s30, %s2536_s30, %s1975_s18  }
  0x5f   : > { %s2316_s29 = sand.u32 (!%p2219_p11), 1, %s1948_s21  }
  0x60   : > { %s2319_s20 = sshll.u32 (!%p2219_p11), %s2316_s29, 2  ;;  %s594_s26 = scalar_lea.sflag (!%p2219_p11), [#allocation8], %s2316_s29 }
  0x61   : > { %s597_s12 = scalar_lea.vmem (!%p2219_p11), [#allocation7], %s2319_s20 }
  0x62   : > { %1907 = dma.done.wait (%p2130_p7), %s594_s26, 64  }
  0x63   : > { %1909 = vsyncadd (%p2130_p7), %s594_s26, 4294967232  ;;  %s2540_s10 = sld [smem:[#allocation36_spill]]  ;;  %s607_s6 = scalar_lea.vmem [#allocation10], %s2319_s20 }
  0x69   : > { %s603_s18 = sand.u32 1, %s2540_s10  }
  0x6a   : > { %s604_s14 = scalar_lea.sflag [#allocation11], %s603_s18 }
  0x6b   : > { %1911 = dma.done.wait (%p2130_p7), %s604_s14, 128  }
  0x6c   : > { %1913 = vsyncadd (%p2130_p7), %s604_s14, 4294967168  ;;  %s2541_s24 = sld [smem:[#allocation29_spill]]  ;;  %s617_s30 = scalar_lea.vmem [#allocation12], %s2319_s20 }
  0x6d   : > { %s624_s3 = scalar_lea.sflag [#allocation14], %s603_s18 }
  0x72   : > { %s2334_s5 = sand.u32 1, %s2541_s24  }
  0x73   : > { %s2337_s17 = sshll.u32 %s2334_s5, 4 }
  0x74   : > { %s627_s28 = scalar_lea.vmem [#allocation13], %s2337_s17 }
  0x75   : > { %1915 = dma.done.wait (%p2154_p13), %s624_s3, 272  }
  0x76   : > { %1917 = vsyncadd (%p2154_p13), %s624_s3, 4294967024  ;;  %s636_s19 = scalar_lea.vmem [#allocation15], %s2334_s5  ;;  %s643_s23 = scalar_lea.sflag [#allocation17], %s603_s18 }
  0x77   : > { %s646_s11 = scalar_lea.vmem [#allocation16], %s2337_s17 }
  0x78   : > { %1919 = dma.done.wait (%p2154_p13), %s643_s23, 512  }
  0x79   : > { %1921 = vsyncadd (%p2154_p13), %s643_s23, 4294966784  ;;  %s656_s13 = scalar_lea.vmem [#allocation18], %s2337_s17  ;;  %s663_s15 = scalar_lea.sflag [#allocation20], %s603_s18 }
  0x7a   : > { %s665_s1 = scalar_lea.vmem [#allocation19], %s2334_s5 }
  0x7b   : > { %1923 = dma.done.wait (%p2154_p13), %s663_s15, 272  }
  0x7c   : > { %1925 = vsyncadd (%p2154_p13), %s663_s15, 4294967024  ;;  %s2543_s16 = sld [smem:[#allocation32_spill]]  ;;  %s1344_s26 = sshll.u32 %s2316_s29, 3 }
  0x7d   : > { %s2544_s24 = sld [smem:[#allocation48_spill]]  ;;  %s675_s18 = scalar_lea.vmem [#allocation21], %s2337_s17 }
  0x7e   : > { %s2365_s23 = scalar_lea.vmem [#allocation22], %s1344_s26 }
  0x82   : > { %p759_p4 = scmp.lt.s32.totalorder %s2543_s16, 3  ;;  %p764_p7 = scmp.eq.s32.totalorder %s2543_s16, 0 }
  0x83   : > { %vm770_vm0 = vcmask (%p764_p7), 261120   ;;  %v1976_v0 = vmov (%p764_p7), 0.0  }
  0x84   : > { %s2572_s16 = smov (!%p759_p4, %s2543_s16), 3  ;;  %769 = sbr.rel (!%p764_p7) target bundleno = 137 (0x89), region = 104  ;;  %771 = vst.msk [vmem:[#allocation6] sm:$0xff] (%p764_p7), %vm770_vm0, %v1976_v0 }
  0x85   : > { %s761_s3 = scalar_lea.vmem %s2544_s24, %s2572_s16 }
  0x89 PF: > { %v1395_v1 = vld [vmem:[%s627_s28 + $0x8] sm:$0xff]  ;;  %v1394_v3 = vld [vmem:[%s627_s28] sm:$0xff]  ;;  %vm796_vm1 = vcmask 261120   ;;  %vm814_vm2 = vcmask 257024   ;;  %vm816_vm3 = vcmask 7168   ;;  %v1977_v20 = vmov -inf  }
  0x8a   : > { %v1397_v2 = vld [vmem:[%s646_s11 + $0x8] sm:$0xff]  ;;  %806 = vmatpush.bf16.msra.mxu0 %v1395_v1  ;;  %v1396_v4 = vld [vmem:[%s646_s11] sm:$0xff]  ;;  %817 = vst.msk [vmem:[#allocation3] sm:$0xff] %vm816_vm3, %v1977_v20  ;;  %vm918_vm4 = vcmask 64512   ;;  %v1978_v26 = vmov 0   ;;  %v1979_v27 = vmov 0.0  }
  0x8b   : > { %851 = vmatpush.bf16.msra.mxu1 %v1397_v2  ;;  %v775_v5 = vld [vmem:[%s597_s12] sm:$0xf]  ;;  %v820_v6 = vld [vmem:[%s607_s6] sm:$0xf]  ;;  %v1554_v7 = vld [vmem:[%s636_s19] ss:$0 sm:$0xff]  ;;  %1551 = vset.pattern.permute.xlu0 %v1978_v26 }
  0x8c   : > { %v1555_v8 = vld [vmem:[%s761_s3] ss:$0 sm:$0xff]  ;;  %v1399_v19 = vld [vmem:[%s656_s13 + $0x8] sm:$0xff]  ;;  %1552 = vset.pattern.permute.xlu1 %v1978_v26  ;;  %1553 = vset.pattern.permute.xlu2 %v1978_v26  ;;  %818 = vst.msk [vmem:[#allocation4] sm:$0xff] %vm816_vm3, %v1979_v27  ;;  %vm953_vm5 = vcmask 1043456   ;;  %s2545_s20 = sld [smem:[#allocation32_spill]] }
  0x8d   : > { %889 = vmatpush.bf16.msra.mxu2 %v1399_v19  ;;  %v1398_v21 = vld [vmem:[%s656_s13] sm:$0xff]  ;;  %v859_v22 = vld [vmem:[%s617_s30] sm:$0xf]  ;;  %819 = vst.msk [vmem:[#allocation5] sm:$0xff] %vm796_vm1, %v1979_v27 }
  0x8e   : > { %807 = vmatpush.bf16.msra.mxu0 %v1394_v3  ;;  %v1556_v32 = vld [vmem:[%s665_s1] ss:$0 sm:$0xff]  ;;  %v1401_v47 = vld [vmem:[%s675_s18 + $0x8] sm:$0xff] }
  0x8f   : > { %852 = vmatpush.bf16.msra.mxu1 %v1396_v4  ;;  %v1400_v49 = vld [vmem:[%s675_s18] sm:$0xff] }
  0x90   : > { %v986_v0 = vld [vmem:[#allocation6] sm:$0xff] }
  0x91   : > { %1354 = vmatmul.msk.bf16.vlgmr.msra.gmra.mxu0 %vm796_vm1, %v775_v5  ;;  %890 = vmatpush.bf16.msra.mxu2 %v1398_v21  ;;  %v917_v28 = vld [vmem:[#allocation3] sm:$0xff] }
  0x92   : > { %1363 = vmatmul.msk.bf16.vlgmr.msra.gmra.mxu1 %vm796_vm1, %v820_v6  ;;  %p1021_p12 = scmp.eq.s32.totalorder %s2545_s20, 3 }
  0x93   : > { %v934_v46 = vld [vmem:[#allocation4] sm:$0xff]  ;;  %1012 = vmatpush.bf16.msrb.mxu1 %v1401_v47  ;;  %s2546_s27 = sld [smem:[#allocation49_spill]] (%p1021_p12) }
  0x94   : > { %1372 = vmatmul.msk.bf16.vlgmr.msra.gmra.mxu2 %vm796_vm1, %v859_v22  ;;  %v942_v56 = vld [vmem:[#allocation5] sm:$0xff] }
  0x97   : > { %1013 = vmatpush.bf16.msrb.mxu1 %v1400_v49 }
  0x99   : > { %v1563_v5 = vld [vmem:[%s2546_s27] ss:$0 sm:$0xff] (%p1021_p12) }
 0x10e   : > { %v809_v9 = vpop.f32.mrf.mxu0 }
 0x10f   : > { %v854_v10 = vpop.f32.mrf.mxu1  ;;  %v810_v11 = vadd.f32 %v1554_v7, %v809_v9 }
 0x110   : > { %v855_v12 = vadd.f32 %v1555_v8, %v854_v10 }
 0x111   : > { %v813_v13 = vpack.c.bf16 %v810_v11, %v810_v11 }
 0x112   : > { %v858_v14 = vpack.c.bf16 %v855_v12, %v855_v12 }
 0x113   : > { %815 = vst.msk [vmem:[#allocation2] sm:$0xf] %vm814_vm2, %v813_v13 }
 0x114   : > { %v902_v15 = vsel %vm796_vm1, %v858_v14, 0 }
 0x115   : > { %911 = vmatpush.bf16.xpose.msra.mxu3 %v902_v15 }
 0x116   : > { %v811_v16 = vpop.f32.mrf.mxu0 }
 0x117   : > { %v856_v17 = vpop.f32.mrf.mxu1  ;;  %v892_v33 = vpop.f32.mrf.mxu2 }
 0x118   : > { %v893_v34 = vadd.f32 %v1556_v32, %v892_v33 }
 0x11a   : > { %v897_v18 = vld [vmem:[#allocation2] sm:$0xf]  ;;  %v896_v35 = vpack.c.bf16 %v893_v34, %v893_v34 }
 0x11c   : > { %1373 = vmatmul.msk.bf16.vlgmr.msra.gmra.mxu3 %vm796_vm1, %v897_v18  ;;  %v955_v36 = vsel %vm953_vm5, %v896_v35, 0 }
 0x11d   : > { %964 = vmatpush.bf16.msrb.mxu0 %v955_v36 }
 0x11f   : > { %v894_v37 = vpop.f32.mrf.mxu2 }
 0x19f   : > { %v913_v23 = vpop.f32.mrf.mxu3 }
 0x1a0   : > { %v919_v24 = vsel %vm918_vm4, %v913_v23, -inf }
 0x1a1   : > { %920 = vmax.xlane.f32.xlu0 %v919_v24 }
 0x1a7   : > { %v915_v25 = vpop.f32.mrf.mxu3 }
 0x214   : > { %v921_v29 = vpop.xlane.xlu0 %920 }
 0x215   : > { %v922_v30 = vmax.f32 %v917_v28, %v921_v29 }
 0x217   : > { %v923_v31 = vsub.f32 %v917_v28, %v922_v30  ;;  %972 = vst.msk [vmem:[#allocation3] sm:$0xff] %vm816_vm3, %v922_v30  ;;  %928 = vperm.xlu0 %1551, %v922_v30  }
 0x219   : > { %v924_v44 = vmul.f32 1.442695, %v923_v31 }
 0x289   : > { %v929_v38 = vpop.permute.xlu0 %928 }
 0x28a   : > { %v931_v39 = vsub.f32 %v913_v23, %v929_v38 }
 0x28c   : > { %v932_v40 = vmul.f32 1.442695, %v931_v39 }
 0x28e   : > { %1557 = vpow2.f32 %v932_v40 }
 0x28f   : > { %1559 = vpow2.f32 %v924_v44 }
 0x294   : > { %v1558_v41 = vpop.eup %1557 }
 0x295   : > { %v936_v42 = vsel %vm918_vm4, %v1558_v41, 0.0  ;;  %v949_v43 = vpack.c.bf16 %v1558_v41, %v1558_v41  ;;  %v1560_v45 = vpop.eup %1559 }
 0x296   : > { %937 = vadd.xlane.f32.xlu1 %v936_v42  ;;  %v935_v48 = vmul.f32 %v1560_v45, %v934_v46 }
 0x297   : > { %1374 = vmatmul.msk.bf16.vlgmr.msrb.gmra.mxu0 %vm918_vm4, %v949_v43 }
 0x2af   : > { %945 = vperm.xlu1 %1552, %v1560_v45  }
 0x309   : > { %v938_v50 = vpop.xlane.xlu1 %937 }
 0x30a   : > { %v939_v51 = vadd.f32 %v938_v50, %v935_v48 }
 0x30c   : > { %941 = vst.msk [vmem:[#allocation4] sm:$0xff] %vm816_vm3, %v939_v51 }
 0x313   : > { %v976_v52 = vld [vmem:[#allocation4] sm:$0xff] }
 0x314   : > { %v966_v53 = vpop.f32.mrf.mxu0  ;;  %1561 = vrcp.f32 %v976_v52 }
 0x31a   : > { %v1562_v54 = vpop.eup %1561 }
 0x31b   : > { %981 = vperm.xlu2 %1553, %v1562_v54  }
 0x31c   : > { %v968_v55 = vpop.f32.mrf.mxu0 }
 0x321   : > { %v946_v57 = vpop.permute.xlu1 %945 }
 0x322   : > { %v948_v58 = vmul.f32 %v946_v57, %v942_v56 }
 0x324   : > { %v970_v59 = vadd.f32 %v966_v53, %v948_v58 }
 0x326   : > { %971 = vst.msk [vmem:[#allocation5] sm:$0xff] %vm796_vm1, %v970_v59 }
 0x32d   : > { %v978_v60 = vld [vmem:[#allocation5] sm:$0xff] }
 0x375   : > { %v982_v61 = vpop.permute.xlu2 %981 }
 0x376   : > { %v984_v62 = vmul.f32 %v982_v61, %v978_v60 }
 0x378   : > { %v985_v63 = vpack.c.bf16 %v984_v62, %v984_v62 }
 0x37a   : > { %1383 = vmatmul.msk.bf16.vlgmr.msrb.gmra.mxu1 %vm796_vm1, %v985_v63 }
 0x3f7   : > { %v1015_v1 = vpop.f32.mrf.mxu1 }
 0x3f8   : > { %v1019_v2 = vadd.f32 %v1015_v1, %v986_v0 }
 0x3fa   : > { %1020 = vst.msk [vmem:[#allocation6] sm:$0xff] %vm796_vm1, %v1019_v2 }
 0x3fb   : > { %1025 = sbr.rel (!%p1021_p12) target bundleno = 1029 (0x405), region = 116 }
 0x3ff   : > { %v1017_v3 = vpop.f32.mrf.mxu1 }
 0x401   : > { %v1026_v4 = vld [vmem:[#allocation6] sm:$0xff] }
 0x402   : > { %v1031_v6 = vadd.f32 %v1563_v5, %v1026_v4 }
 0x404   : > { %1032 = vst.msk [vmem:[%s2365_s23] sm:$0xff] %vm796_vm1, %v1031_v6 }
 0x405 PF: > { %s2547_s5 = sld [smem:[#allocation33_spill]]  ;;  %s1047_s15 = sshll.u32 %s2365_s23, 4  ;;  %s1048_s15 = int_to_ptr.vmem [resolvable:$true] %s1047_s15 }
 0x406   : > { %s2549_s11 = sld [smem:[#allocation50_spill]]  ;;  %s1034_s16 = scalar_lea.sflag [#allocation9], %s2316_s29 }
 0x40b   : > { %s1386_s30 = sshll.u32 %s2547_s5, 3 }
 0x40c   : > { %s1045_s13 = scalar_lea.hbm %s2549_s11, %s1386_s30  ;;  %s1854_s3 = scalar_lea.hbm %s2549_s11, 16 }
 0x40d   : > { %s1049_s1 = sshll.u32 %s1045_s13, 4  ;;  %s1050_s1 = int_to_ptr.hbm [resolvable:$true] %s1049_s1 }
 0x40e   : > { %s1848_s26 = sshra.s32 %s1050_s1, 4  ;;  %s1849_s26 = int_to_ptr.hbm [resolvable:$true] %s1848_s26 }
 0x40f   : > { %s1850_s10 = scalar_lea.hbm %s1849_s26, 8  ;;  %p1855_p10 = scmp.lt.s32.totalorder %s1849_s26, %s2549_s11 }
 0x410   : > { %p1851_p13 = scmp.ne.s32.totalorder %s1849_s26, %s1850_s10  ;;  %p1856_p1 = scmp.lt.s32.totalorder %s1854_s3, %s1850_s10 }
 0x412   : > { %p1852_p0 = pnand %p1851_p13, %p2163_p8  ;;  %p1857_p3 = por %p1856_p1, %p1855_p10 }
 0x414   : > { %p1853_p5 = pneg %p1852_p0 }
 0x416   : > { %p1858_p6 = pnand %p1857_p3, %p1853_p5 }
 0x418   : > { %1861 = shalt.err (!%p1858_p6)
}
 0x419   : > { %1421 = dma.vmem_to_hbm [thread:$0]  (%p2163_p8), %s1048_s15, 128, %s1050_s1, %s1034_s16  }
 0x41a PF: > { %s2550_s29 = sld [smem:[#allocation35_spill]] }
 0x41b   : > { %s2551_s23 = sld [smem:[#allocation31_spill]] }
 0x420   : > { %p1456_p9 = scmp.ge.s32.totalorder %s2550_s29, 2 }
 0x421   : > { %s1061_s6 = sand.u32 1, %s2551_s23  }
 0x422   : > { %p1452_p11 = pnand %p1456_p9, %p2170_p2  ;;  %s1062_s27 = scalar_lea.sflag [#allocation9], %s1061_s6 }
 0x424   : > { %p1453_p4 = pneg %p1452_p11 }
 0x426   : > { %1927 = dma.done.wait (%p1453_p4), %s1062_s27, 128  }
 0x427   : > { %1929 = vsyncadd (%p1453_p4), %s1062_s27, 4294967168  ;;  %s39_s27 = sadd.s32 1, %s2550_s29   ;;  %s2553_s17 = sld [smem:[#allocation29_spill]] }
 0x428   : > { %p36_p7 = scmp.ge.s32.totalorder %s39_s27, 10   ;;  %s2554_s18 = sld [smem:[#allocation30_spill]] }
 0x429   : > { %s2555_s19 = sld [smem:[#allocation40_spill]]  ;;  %s2560_s20 = smov %s1948_s21 }
 0x42a   : > { %s2556_s5 = sld [smem:[#allocation41_spill]]  ;;  %s2561_s21 = smov %s1952_s22 }
 0x42b   : > { %s2557_s24 = sld [smem:[#allocation34_spill]]  ;;  %s2563_s23 = smov %s1964_s25 }
 0x42c   : > { %s2558_s30 = sld [smem:[#allocation37_spill]] }
 0x42d   : > { %s2559_s26 = sld [smem:[#allocation38_spill]] }
 0x42e   :  { %38 = sbr.rel (!%p36_p7) target bundleno = 24 (0x18), region = 224 }
 0x430   : > { %s2562_s22 = smov %s2556_s5 }
 0x432   : > { %s2564_s25 = smov %s2558_s30 }
 0x433   :  { %1068 = vsyncpa [#allocation8], 1 }
 0x434   :  { %1070 = vsyncpa [#allocation8 + $0x1], 1 }
 0x435   :  { %1071 = vsyncpa [#allocation11], 1 }
 0x436   :  { %1073 = vsyncpa [#allocation11 + $0x1], 1 }
 0x437   :  { %1074 = vsyncpa [#allocation14], 1 }
 0x438   :  { %1076 = vsyncpa [#allocation14 + $0x1], 1 }
 0x439   :  { %1077 = vsyncpa [#allocation17], 1 }
 0x43a   :  { %1079 = vsyncpa [#allocation17 + $0x1], 1 }
 0x43b   :  { %1080 = vsyncpa [#allocation20], 1 }
 0x43c   :  { %1082 = vsyncpa [#allocation20 + $0x1], 1 }
 0x43d   :  { %1083 = vsyncpa [#allocation9], 1 }
 0x43e   :  { %1085 = vsyncpa [#allocation9 + $0x1], 1 }

</bundles_post_ra>
